<compile_context>
chip_gen: v6e
topology: v6e:2x2x1
jax: 0.10.0
libtpu: 0.0.40
codegen_flags: <defaults>
</compile_context>

<pallas_src>
import math

import jax
import jax.numpy as jnp
from jax.experimental import pallas as pl
from jax.experimental.pallas import tpu as pltpu


def meta_fusion_kernel(img_ref, meta_ref, wpt_ref, bp_ref,
                       wa_img_ref, wa_meta_ref, ba_ref, out_ref):
    img = img_ref[...]                                            # [Bt, Fp] native dtype

    # meta projection: [Bt, M] @ [M, Fp] -> [Bt, Fp], f32 accumulation on MXU.
    meta = jnp.dot(meta_ref[...], wpt_ref[...],
                   preferred_element_type=jnp.float32)
    meta = meta + bp_ref[...].astype(jnp.float32)                 # [Bt, Fp] f32

    # attention logit = concat([img, meta]) @ W_attn^T + b_attn, done as a VPU
    # multiply + XLU lane-reduce against the [1, Fp] weight rows.  The
    # reduction and the sigmoid stay in f32 for accuracy.
    logit = jnp.sum((img * wa_img_ref[...]).astype(jnp.float32)
                    + meta * wa_meta_ref[...].astype(jnp.float32),
                    axis=-1, keepdims=True) + ba_ref[0]           # [Bt, 1] f32

    gate = jax.nn.sigmoid(logit)                                  # [Bt, 1] f32
    out_ref[...] = (img * gate + meta * (1.0 - gate)).astype(out_ref.dtype)


def _choose_batch_tile(B, Fp, M, itemsize, tile_budget_bytes):
    """Largest sublane-aligned batch tile fitting the VMEM budget, capped at
    1024 rows, and forced to give >= 2 grid steps when the batch permits."""
    per_row = 2 * (2 * Fp + M) * itemsize          # double-buffered img/meta/out rows
    resident = (M * Fp + 3 * Fp) * itemsize        # single-buffered weights + biases
    avail = max(tile_budget_bytes - resident, per_row * 8)
    bt = int(avail // per_row)
    bt = max(8, min(bt, 1024, B))
    if bt < B:
        bt = max(8, (bt // 8) * 8)                 # sublane alignment
    # Guarantee >= 2 grid steps when the batch allows (both TCs busy on v7x).
    if B >= 16 and bt >= B:
        bt = max(8, ((pl.cdiv(B, 2) + 7) // 8) * 8)
        if bt >= B:
            bt = B
    return bt


def meta_fusion(img_feat, meta_feat, w_proj, b_proj, w_attn, b_attn, *,
                tile_budget_bytes=36 << 20, vmem_limit_bytes=48 << 20):
    """img_feat: [B, F], meta_feat: [B, M],
       w_proj: [F, M] (PyTorch layout), b_proj: [F],
       w_attn: [1, 2F] (PyTorch layout), b_attn: [1]."""
    B, F = img_feat.shape
    M = meta_feat.shape[-1]
    itemsize = jnp.dtype(img_feat.dtype).itemsize

    # ---- wrapper-side layout plumbing (one-time XLA ops) --------------------
    # Pad F to a multiple of 128 so kernel loads/stores are lane-dense.
    Fp = ((F + 127) // 128) * 128
    pad_f = Fp - F
    wpt = w_proj.T                                               # [M, F] MXU-native
    wa_img = w_attn[:, :F]                                       # [1, F]
    wa_meta = w_attn[:, F:]                                      # [1, F]
    bp = b_proj.reshape(1, F)                                    # [1, F]
    if pad_f:
        img_in = jnp.pad(img_feat, ((0, 0), (0, pad_f)))
        wpt = jnp.pad(wpt, ((0, 0), (0, pad_f)))
        bp = jnp.pad(bp, ((0, 0), (0, pad_f)))
        wa_img = jnp.pad(wa_img, ((0, 0), (0, pad_f)))
        wa_meta = jnp.pad(wa_meta, ((0, 0), (0, pad_f)))
    else:
        img_in = img_feat
    ba = b_attn.reshape(1).astype(jnp.float32)                   # SMEM scalar

    # ---- tiling --------------------------------------------------------------
    bt = _choose_batch_tile(B, Fp, M, itemsize, tile_budget_bytes)
    grid = (pl.cdiv(B, bt),)

    tiled = lambda i: (i, 0)
    fixed = lambda i: (0, 0)

    cost = pl.CostEstimate(
        flops=2 * B * M * Fp + 7 * B * Fp,
        transcendentals=B,
        bytes_accessed=(2 * B * Fp + B * M + M * Fp + 3 * Fp + 1) * itemsize)

    out_p = pl.pallas_call(
        meta_fusion_kernel,
        out_shape=jax.ShapeDtypeStruct((B, Fp), img_feat.dtype),
        grid=grid,
        in_specs=[
            pl.BlockSpec((bt, Fp), tiled),                                # img_feat
            pl.BlockSpec((bt, M), tiled),                                 # meta_feat
            pl.BlockSpec((M, Fp), fixed, pipeline_mode=pl.Buffered(1)),   # W_proj^T (resident)
            pl.BlockSpec((1, Fp), fixed, pipeline_mode=pl.Buffered(1)),   # b_proj   (resident)
            pl.BlockSpec((1, Fp), fixed, pipeline_mode=pl.Buffered(1)),   # W_attn img half
            pl.BlockSpec((1, Fp), fixed, pipeline_mode=pl.Buffered(1)),   # W_attn meta half
            pl.BlockSpec(memory_space=pltpu.MemorySpace.SMEM),            # b_attn scalar
        ],
        out_specs=pl.BlockSpec((bt, Fp), tiled),
        compiler_params=pltpu.CompilerParams(
            dimension_semantics=("parallel",),
            vmem_limit_bytes=vmem_limit_bytes),
        cost_estimate=cost,
    )(img_in, meta_feat, wpt, bp, wa_img, wa_meta, ba)

    return out_p[:, :F] if pad_f else out_p


def reference(img_feat, meta_feat, w_proj, b_proj, w_attn, b_attn):
    meta = meta_feat @ w_proj.T + b_proj
    combined = jnp.concatenate([img_feat, meta], axis=-1)
    gate = jax.nn.sigmoid(combined @ w_attn.T + b_attn)
    return img_feat * gate + meta * (1.0 - gate)


if __name__ == "__main__":
    B, FEAT, META = 8, 32, 16

    key = jax.random.PRNGKey(0)
    k_img, k_meta, k_wp, k_bp, k_wa, k_ba = jax.random.split(key, 6)

    img_feat = jax.random.normal(k_img, (B, FEAT), dtype=jnp.float32)
    meta_feat = jax.random.normal(k_meta, (B, META), dtype=jnp.float32)

    # Deterministic PyTorch-style uniform init: U(-1/sqrt(fan_in), 1/sqrt(fan_in))
    bound_p = 1.0 / math.sqrt(META)
    w_proj = jax.random.uniform(k_wp, (FEAT, META), minval=-bound_p, maxval=bound_p)
    b_proj = jax.random.uniform(k_bp, (FEAT,), minval=-bound_p, maxval=bound_p)

    bound_a = 1.0 / math.sqrt(2 * FEAT)
    w_attn = jax.random.uniform(k_wa, (1, 2 * FEAT), minval=-bound_a, maxval=bound_a)
    b_attn = jax.random.uniform(k_ba, (1,), minval=-bound_a, maxval=bound_a)

    out = meta_fusion(img_feat, meta_feat, w_proj, b_proj, w_attn, b_attn)
    out = jax.block_until_ready(out)

    ref = reference(img_feat, meta_feat, w_proj, b_proj, w_attn, b_attn)
    assert out.shape == (B, FEAT)
    assert jnp.allclose(out, ref, atol=1e-5, rtol=1e-5), "mismatch vs reference"

    print("KERNEL_OK")
</pallas_src>

<mosaic_0001>
module attributes {stable_mosaic.version = 11 : i64} {
  func.func @meta_fusion_kernel(%arg0: i32, %arg1: memref<8x128xf32, #tpu.memory_space<vmem>>, %arg2: memref<8x16xf32, #tpu.memory_space<vmem>>, %arg3: memref<16x128xf32, #tpu.memory_space<vmem>>, %arg4: memref<1x128xf32, #tpu.memory_space<vmem>>, %arg5: memref<1x128xf32, #tpu.memory_space<vmem>>, %arg6: memref<1x128xf32, #tpu.memory_space<vmem>>, %arg7: memref<1xf32, #tpu.memory_space<smem>>, %arg8: memref<8x128xf32, #tpu.memory_space<vmem>>) attributes {dimension_semantics = [#tpu.dimension_semantics<parallel>], iteration_bounds = array<i64: 1>, scalar_prefetch = 0 : i64, scratch_operands = 0 : i64, tpu.core_type = #tpu.core_type<tc>, window_params = [{transform_indices = @transform_0, window_bounds = array<i64: 8, 128>}, {transform_indices = @transform_1, window_bounds = array<i64: 8, 16>}, {pipeline_mode = #tpu.pipeline_mode<synchronous>, transform_indices = @transform_2, window_bounds = array<i64: 16, 128>}, {pipeline_mode = #tpu.pipeline_mode<synchronous>, transform_indices = @transform_3, window_bounds = array<i64: 1, 128>}, {pipeline_mode = #tpu.pipeline_mode<synchronous>, transform_indices = @transform_4, window_bounds = array<i64: 1, 128>}, {pipeline_mode = #tpu.pipeline_mode<synchronous>, transform_indices = @transform_5, window_bounds = array<i64: 1, 128>}, {transform_indices = @transform_6, window_bounds = array<i64: 1>}, {transform_indices = @transform_7, window_bounds = array<i64: 8, 128>}]} {
    %c0 = arith.constant 0 : index
    %c0_0 = arith.constant 0 : index
    %0 = vector.load %arg1[%c0, %c0_0] : memref<8x128xf32, #tpu.memory_space<vmem>>, vector<8x128xf32>
    %c0_1 = arith.constant 0 : index
    %c0_2 = arith.constant 0 : index
    %1 = vector.load %arg2[%c0_1, %c0_2] : memref<8x16xf32, #tpu.memory_space<vmem>>, vector<8x16xf32>
    %c0_3 = arith.constant 0 : index
    %c0_4 = arith.constant 0 : index
    %2 = vector.load %arg3[%c0_3, %c0_4] : memref<16x128xf32, #tpu.memory_space<vmem>>, vector<16x128xf32>
    %cst = arith.constant dense<0.000000e+00> : vector<8x128xf32>
    %3 = tpu.matmul %1, %2, %cst {dimension_numbers = #tpu.dot_dimension_numbers<[1], [0], [0], [1], [0, 0, 1, 1], [], []>} : vector<8x16xf32>, vector<16x128xf32>, vector<8x128xf32> -> vector<8x128xf32>
    %c0_5 = arith.constant 0 : index
    %c0_6 = arith.constant 0 : index
    %4 = vector.load %arg4[%c0_5, %c0_6] : memref<1x128xf32, #tpu.memory_space<vmem>>, vector<1x128xf32>
    %5 = vector.broadcast %4 : vector<1x128xf32> to vector<8x128xf32>
    %6 = arith.addf %3, %5 : vector<8x128xf32>
    %c0_7 = arith.constant 0 : index
    %c0_8 = arith.constant 0 : index
    %7 = vector.load %arg5[%c0_7, %c0_8] : memref<1x128xf32, #tpu.memory_space<vmem>>, vector<1x128xf32>
    %8 = vector.broadcast %7 : vector<1x128xf32> to vector<8x128xf32>
    %9 = arith.mulf %0, %8 : vector<8x128xf32>
    %c0_9 = arith.constant 0 : index
    %c0_10 = arith.constant 0 : index
    %10 = vector.load %arg6[%c0_9, %c0_10] : memref<1x128xf32, #tpu.memory_space<vmem>>, vector<1x128xf32>
    %11 = vector.broadcast %10 : vector<1x128xf32> to vector<8x128xf32>
    %12 = arith.mulf %6, %11 : vector<8x128xf32>
    %13 = arith.addf %9, %12 : vector<8x128xf32>
    %cst_11 = arith.constant dense<0.000000e+00> : vector<8xf32>
    %14 = vector.multi_reduction <add>, %13, %cst_11 [1] : vector<8x128xf32> to vector<8xf32>
    %15 = vector.shape_cast %14 : vector<8xf32> to vector<8x1xf32>
    %c0_12 = arith.constant 0 : index
    %16 = memref.load %arg7[%c0_12] : memref<1xf32, #tpu.memory_space<smem>>
    %17 = vector.broadcast %16 : f32 to vector<8x1xf32>
    %18 = arith.addf %15, %17 : vector<8x1xf32>
    %19 = arith.negf %18 : vector<8x1xf32>
    %20 = math.exp %19 : vector<8x1xf32>
    %cst_13 = arith.constant 1.000000e+00 : f32
    %21 = vector.broadcast %cst_13 : f32 to vector<8x1xf32>
    %22 = arith.addf %21, %20 : vector<8x1xf32>
    %23 = arith.divf %21, %22 : vector<8x1xf32>
    %24 = vector.broadcast %23 : vector<8x1xf32> to vector<8x128xf32>
    %25 = arith.mulf %0, %24 : vector<8x128xf32>
    %cst_14 = arith.constant 1.000000e+00 : f32
    %26 = vector.broadcast %cst_14 : f32 to vector<8x1xf32>
    %27 = arith.subf %26, %23 : vector<8x1xf32>
    %28 = vector.broadcast %27 : vector<8x1xf32> to vector<8x128xf32>
    %29 = arith.mulf %6, %28 : vector<8x128xf32>
    %30 = arith.addf %25, %29 : vector<8x128xf32>
    %c0_15 = arith.constant 0 : index
    %c0_16 = arith.constant 0 : index
    %31 = vector.load %arg8[%c0_15, %c0_16] : memref<8x128xf32, #tpu.memory_space<vmem>>, vector<8x128xf32>
    tpu.vector_store %arg8[%c0_15, %c0_16], %30 {strides = array<i32>} : memref<8x128xf32, #tpu.memory_space<vmem>>, vector<8x128xf32>,
    return
  }
  func.func @transform_0(%arg0: i32) -> (i32, i32) {
    %c0_i32 = arith.constant 0 : i32
    %c0_i32_0 = arith.constant 0 : i32
    return %arg0, %c0_i32 : i32, i32
  }
  func.func @transform_1(%arg0: i32) -> (i32, i32) {
    %c0_i32 = arith.constant 0 : i32
    %c0_i32_0 = arith.constant 0 : i32
    return %arg0, %c0_i32 : i32, i32
  }
  func.func @transform_2(%arg0: i32) -> (i32, i32) {
    %c0_i32 = arith.constant 0 : i32
    %c0_i32_0 = arith.constant 0 : i32
    %c0_i32_1 = arith.constant 0 : i32
    return %c0_i32, %c0_i32_0 : i32, i32
  }
  func.func @transform_3(%arg0: i32) -> (i32, i32) {
    %c0_i32 = arith.constant 0 : i32
    %c0_i32_0 = arith.constant 0 : i32
    %c0_i32_1 = arith.constant 0 : i32
    return %c0_i32, %c0_i32_0 : i32, i32
  }
  func.func @transform_4(%arg0: i32) -> (i32, i32) {
    %c0_i32 = arith.constant 0 : i32
    %c0_i32_0 = arith.constant 0 : i32
    %c0_i32_1 = arith.constant 0 : i32
    return %c0_i32, %c0_i32_0 : i32, i32
  }
  func.func @transform_5(%arg0: i32) -> (i32, i32) {
    %c0_i32 = arith.constant 0 : i32
    %c0_i32_0 = arith.constant 0 : i32
    %c0_i32_1 = arith.constant 0 : i32
    return %c0_i32, %c0_i32_0 : i32, i32
  }
  func.func @transform_6(%arg0: i32) -> i32 {
    %c0_i32 = arith.constant 0 : i32
    %c0_i32_0 = arith.constant 0 : i32
    return %c0_i32 : i32
  }
  func.func @transform_7(%arg0: i32) -> (i32, i32) {
    %c0_i32 = arith.constant 0 : i32
    %c0_i32_0 = arith.constant 0 : i32
    return %arg0, %c0_i32 : i32, i32
  }
}

</mosaic_0001>

<bundles_post_ra>
// kernel: tpu_custom_call.1
= control target key start
LH: loop header
LB: loop body
LE: loop exit
PB: predicated region body
PF: predicated region fallthrough
CT: control target
= control target key end

     0   :  { %13 = vsyncpa [#allocation4], 0  ;;  %s384_s0 = inlined_call_operand.hbm [shape: f32[8,128], index: 0, kind: input, shape index: {}]   ;;  %s385_s1 = inlined_call_operand.hbm [shape: f32[8,16], index: 1, kind: input, shape index: {}]   ;;  %s386_s2 = inlined_call_operand.hbm [shape: f32[16,128], index: 2, kind: input, shape index: {}]   ;;  %s387_s3 = inlined_call_operand.vmem [shape: f32[1,128], index: 3, kind: input, shape index: {}]   ;;  %s388_s4 = inlined_call_operand.vmem [shape: f32[1,128], index: 4, kind: input, shape index: {}]   ;;  %s389_s5 = inlined_call_operand.vmem [shape: f32[1,128], index: 5, kind: input, shape index: {}]   ;;  %s390_s6 = inlined_call_operand.<no memory space> [shape: f32[1], index: 6, kind: input, shape index: {}]   ;;  %s391_s7 = inlined_call_operand.hbm [shape: f32[8,128], index: 7, kind: output, shape index: {}]  }
   0x1   :  { %14 = vsyncpa [#allocation7], 0 }
   0x2   :  { %15 = vsyncpa [#allocation5], 0  ;;  %s312_s24 = smov [#allocation6]   ;;  %s313_s26 = smov [#allocation3]  }
   0x3   :  { %s32_s25 = sshll.u32 %s312_s24, 4  ;;  %s22_s27 = sshll.u32 %s313_s26, 4  ;;  %s33_s25 = int_to_ptr.vmem [resolvable:$true] %s32_s25  ;;  %s23_s27 = int_to_ptr.vmem [resolvable:$true] %s22_s27 }
   0x4   :  { %s234_s28 = scalar_lea.vmem %s33_s25, 128  ;;  %p239_p1 = scmp.lt.s32.totalorder %s33_s25, %s33_s25 }
   0x5   :  { %p235_p0 = scmp.ne.s32.totalorder %s33_s25, %s234_s28  ;;  %p240_p2 = scmp.lt.s32.totalorder %s234_s28, %s234_s28 }
   0x7   :  { %p241_p3 = por %p240_p2, %p239_p1 }
   0x9   :  { %p242_p4 = pnand %p241_p3, %p235_p0 }
   0xb   :  { %245 = shalt.err (!%p242_p4)
}
   0xc   :  { %35 = dma.hbm_to_vmem [thread:$0]  %s385_s1, 128, %s33_s25, [#allocation7]  }
   0xd   :  { %s254_s8 = scalar_lea.vmem %s23_s27, 128  ;;  %p259_p6 = scmp.lt.s32.totalorder %s23_s27, %s23_s27 }
   0xe   :  { %p255_p5 = scmp.ne.s32.totalorder %s23_s27, %s254_s8  ;;  %p260_p7 = scmp.lt.s32.totalorder %s254_s8, %s254_s8 }
  0x10   :  { %p261_p8 = por %p260_p7, %p259_p6 }
  0x12   :  { %p262_p9 = pnand %p261_p8, %p255_p5 }
  0x14   :  { %265 = shalt.err (!%p262_p9)
}
  0x15   :  { %25 = dma.hbm_to_vmem [thread:$0]  %s384_s0, 128, %s23_s27, [#allocation4]  }
  0x16   :  { %s314_s11 = smov [#allocation8]  }
  0x17   :  { %s41_s12 = sshll.u32 %s314_s11, 4  ;;  %s42_s12 = int_to_ptr.vmem [resolvable:$true] %s41_s12 }
  0x18   :  { %s274_s13 = scalar_lea.vmem %s42_s12, 256  ;;  %p279_p11 = scmp.lt.s32.totalorder %s42_s12, %s42_s12 }
  0x19   :  { %p275_p10 = scmp.ne.s32.totalorder %s42_s12, %s274_s13  ;;  %p280_p12 = scmp.lt.s32.totalorder %s274_s13, %s274_s13 }
  0x1b   :  { %p281_p13 = por %p280_p12, %p279_p11 }
  0x1d   :  { %p282_p0 = pnand %p281_p13, %p275_p10 }
  0x1f   :  { %285 = shalt.err (!%p282_p0)
}
  0x20   :  { %s315_s1 = smov 128   ;;  %s316_s14 = smov 8  }
  0x21   :  { %47 = dma.hbm_to_vmem [thread:$0]  %s386_s2, 256, %s42_s12, [#allocation7], %s315_s1, %s315_s1, %s316_s14  }
  0x22   :  { %306 = dma.done.wait [#allocation4], 128  }
  0x23   :  { %307 = vsyncadd [#allocation4], 4294967168 }
  0x24   :  { %308 = dma.done.wait [#allocation7], 384  }
  0x25   :  { %309 = vsyncadd [#allocation7], 4294966912  ;;  %v317_v0 = vmov 0.0   ;;  %vm318_vm0 = vmmov 0   ;;  %v68_v1 = vld [vmem:[#allocation8 + $0x8] sm:$0xff]  ;;  %v67_v2 = vld [vmem:[#allocation8] sm:$0xff]  ;;  %v170_v14 = vstv %s390_s6 }
  0x26   :  { %207 = vmatprep.subr.mxu0 %v317_v0  ;;  %211 = vmatprep.mubr.msk.f32.mxu0 %vm318_vm0, %v317_v0  ;;  %v66_v3 = vld [vmem:[#allocation6] sm:$0xff]  ;;  %vm76_vm1 = vcmask 130048   ;;  %v199_v4 = vld [vmem:[%s387_s3] ss:$0 sm:$0xff]  ;;  %s319_s3 = smov [#allocation9]  }
  0x27   :  { %208 = vmatpush3.msra.mxu0 %v68_v1  ;;  %v65_v5 = vld [vmem:[#allocation3] sm:$0xff] }
  0x28   :  { %209 = vmatprep.subr.mxu0 %v317_v0  ;;  %v201_v6 = vld [vmem:[%s388_s4] ss:$0 sm:$0xff]  ;;  %s189_s4 = sshll.u32 %s319_s3, 4  ;;  %s190_s4 = int_to_ptr.vmem [resolvable:$true] %s189_s4 }
  0x29   :  { %210 = vmatpush3.msra.mxu0 %v67_v2  ;;  %v202_v8 = vld [vmem:[%s389_s5] ss:$0 sm:$0xff]  ;;  %v157_v10 = vmul.f32 %v201_v6, %v65_v5  ;;  %s286_s5 = scalar_lea.vmem %s190_s4, 128  ;;  %p291_p2 = scmp.lt.s32.totalorder %s190_s4, %s190_s4 }
  0x2a   :  { %212 = vmatmul.mubr.msk.f32.vlgmr.msra.gmra.mxu0 %vm76_vm1, %v66_v3  ;;  %p287_p1 = scmp.ne.s32.totalorder %s190_s4, %s286_s5  ;;  %p292_p3 = scmp.lt.s32.totalorder %s286_s5, %s286_s5 }
  0x2c   :  { %p293_p4 = por %p292_p3, %p291_p2 }
  0x2e   :  { %p294_p5 = pnand %p293_p4, %p287_p1 }
  0xea   :  { %v146_v7 = vpop.f32.mrf.mxu0 }
  0xeb   :  { %v147_v9 = vadd.f32 %v199_v4, %v146_v7 }
  0xec   :  { %v213_v11 = vpop.f32.mrf.mxu0 }
  0xed   :  { %v165_v12 = vmul.f32 %v202_v8, %v147_v9 }
  0xef   :  { %v166_v13 = vadd.f32 %v165_v12, %v157_v10 }
  0xf1   :  { %167 = vadd.xlane.f32.xlu0 %v166_v13 }
 0x17a   :  { %v168_v15 = vpop.xlane.xlu0 %167 }
 0x17b   :  { %v171_v16 = vadd.f32 %v170_v14, %v168_v15 }
 0x17d   :  { %v203_v17 = vmul.f32 -1.442695, %v171_v16 }
 0x17f   :  { %222 = vpow2.f32 %v203_v17 }
 0x18c   :  { %v223_v18 = vpop.eup %222 }
 0x18d   :  { %v175_v19 = vadd.f32 1.0, %v223_v18 }
 0x18f   :  { %224 = vrcp.f32 %v175_v19 }
 0x19c   :  { %v225_v20 = vpop.eup %224 }
 0x19d   :  { %v179_v21 = vsub.f32 1.0, %v225_v20  ;;  %v178_v22 = vmul.f32 %v225_v20, %v65_v5 }
 0x19f   :  { %v180_v23 = vmul.f32 %v179_v21, %v147_v9 }
 0x1a1   :  { %v181_v24 = vadd.f32 %v180_v23, %v178_v22 }
 0x1a3   :  { %182 = vst [vmem:[#allocation9] sm:$0xff] %v181_v24 }
 0x1a4   :  { %297 = shalt.err (!%p294_p5)
}
 0x1a5   :  { %192 = dma.vmem_to_hbm [thread:$0]  %s190_s4, 128, %s391_s7, [#allocation5]  }
 0x1a6   :  { %310 = dma.done.wait [#allocation5], 128  }
 0x1a7   :  { %311 = vsyncadd [#allocation5], 4294967168 }
 0x1a8   :  { %196 = vsyncpa [#allocation4], 1 }
 0x1a9   :  { %197 = vsyncpa [#allocation7], 1 }
 0x1aa   :  { %198 = vsyncpa [#allocation5], 1 }

</bundles_post_ra>
